<compile_context>
chip_gen: v6e
topology: v6e:2x2x1
jax: 0.10.0
libtpu: 0.0.40
codegen_flags: <defaults>
</compile_context>

<pallas_src>
import jax
import jax.numpy as jnp
from jax.experimental import pallas as pl
from jax.experimental.pallas import tpu as pltpu


def base_module_forward(x):
    """BaseModule.forward — identity. No kernel, no HBM traffic."""
    return x


# ----------------------------------------------------------------------------
# Optional materialized-copy path (optimized Pallas copy kernel).
# ----------------------------------------------------------------------------

_LANE = 128
_LANE_CAP = 2048                       # max block width in lanes
_TARGET_BLOCK_BYTES = 4 * 1024 * 1024  # ~4 MiB per buffer: safe on v5e/v6e/v7x


def _identity_kernel(x_ref, o_ref):
    # Pure passthrough of the current tile: o = x
    o_ref[...] = x_ref[...]


def _lane_dense_cols(numel):
    """Largest multiple-of-128 divisor of numel, capped at _LANE_CAP (or None)."""
    best = None
    cap = min(numel, _LANE_CAP)
    c = _LANE
    while c <= cap:
        if numel % c == 0:
            best = c
        c += _LANE
    return best


def _pallas_copy_2d(x2):
    """Tiled VMEM copy of a 2-D array (rows tiled, full lane-dense width)."""
    R, C = x2.shape
    itemsize = jnp.dtype(x2.dtype).itemsize
    # Sublane minimum: 8 for 32-bit, 16 for bf16/fp16, 32 for int8/fp8.
    sub_min = max(8, 32 // itemsize)

    rows_for_target = max(1, _TARGET_BLOCK_BYTES // (C * itemsize))
    tr = min(R, rows_for_target)
    if tr >= sub_min:
        tr = (tr // sub_min) * sub_min       # round down to sublane multiple
    elif R >= sub_min:
        tr = sub_min
    else:
        tr = R                               # tiny array: full extent is legal & small

    grid = (pl.cdiv(R, tr),)                 # masked tail block, never whole-array-in-VMEM

    return pl.pallas_call(
        _identity_kernel,
        out_shape=jax.ShapeDtypeStruct((R, C), x2.dtype),
        grid=grid,
        in_specs=[pl.BlockSpec((tr, C), lambda i: (i, 0))],
        out_specs=pl.BlockSpec((tr, C), lambda i: (i, 0)),
        compiler_params=pltpu.CompilerParams(
            dimension_semantics=("parallel",),
            vmem_limit_bytes=32 * 1024 * 1024,
        ),
        cost_estimate=pl.CostEstimate(
            flops=0,
            transcendentals=0,
            bytes_accessed=2 * R * C * itemsize,
        ),
    )(x2)


@jax.jit
def pallas_identity_copy(x):
    """Materialized identity copy of x via an optimized Pallas TPU copy kernel.

    Accepts any-rank input (e.g. NCHW). Returns a new array with identical
    shape / dtype / values.
    """
    if x.ndim == 0 or x.size == 0:
        # Degenerate cases: bypass the kernel.
        return x

    orig_shape = x.shape
    numel = x.size

    cols = _lane_dense_cols(numel)
    if cols is not None:
        # Lane-dense layout: last dim is a large multiple of 128.
        R, C = numel // cols, cols
    else:
        # numel not a multiple of 128: keep the original last dim (a full-extent
        # lane dim is always a legal block) and tile only over rows.
        C = x.shape[-1]
        R = numel // C

    x2 = x.reshape(R, C)
    out2 = _pallas_copy_2d(x2)
    return out2.reshape(orig_shape)


if __name__ == "__main__":
    key = jax.random.PRNGKey(0)
    # Small NCHW input consistent with a conv-style module: batch=2, channels=4,
    # spatial=16x16.
    x = jax.random.normal(key, (2, 4, 16, 16), dtype=jnp.float32)

    # Zero-cost forward (the actual BaseModule semantics).
    y_fast = base_module_forward(x)
    assert y_fast is x or bool(jnp.array_equal(y_fast, x))

    # Materialized-copy Pallas kernel (run once, block on result).
    y = pallas_identity_copy(x)
    y = jax.block_until_ready(y)

    assert y.shape == x.shape, (y.shape, x.shape)
    assert y.dtype == x.dtype, (y.dtype, x.dtype)
    assert bool(jnp.array_equal(y, x)), "identity forward mismatch"

    print("KERNEL_OK")
</pallas_src>

<mosaic_0001>
module attributes {stable_mosaic.version = 11 : i64} {
  func.func @_identity_kernel(%arg0: i32, %arg1: memref<1x2048xf32, #tpu.memory_space<vmem>>, %arg2: memref<1x2048xf32, #tpu.memory_space<vmem>>) attributes {dimension_semantics = [#tpu.dimension_semantics<parallel>], iteration_bounds = array<i64: 1>, scalar_prefetch = 0 : i64, scratch_operands = 0 : i64, tpu.core_type = #tpu.core_type<tc>, window_params = [{transform_indices = @transform_0, window_bounds = array<i64: 1, 2048>}, {transform_indices = @transform_1, window_bounds = array<i64: 1, 2048>}]} {
    %c0 = arith.constant 0 : index
    %c0_0 = arith.constant 0 : index
    %0 = vector.load %arg1[%c0, %c0_0] : memref<1x2048xf32, #tpu.memory_space<vmem>>, vector<1x2048xf32>
    %c0_1 = arith.constant 0 : index
    %c0_2 = arith.constant 0 : index
    %1 = vector.load %arg2[%c0_1, %c0_2] : memref<1x2048xf32, #tpu.memory_space<vmem>>, vector<1x2048xf32>
    tpu.vector_store %arg2[%c0_1, %c0_2], %0 {strides = array<i32>} : memref<1x2048xf32, #tpu.memory_space<vmem>>, vector<1x2048xf32>,
    return
  }
  func.func @transform_0(%arg0: i32) -> (i32, i32) {
    %c0_i32 = arith.constant 0 : i32
    %c0_i32_0 = arith.constant 0 : i32
    return %arg0, %c0_i32 : i32, i32
  }
  func.func @transform_1(%arg0: i32) -> (i32, i32) {
    %c0_i32 = arith.constant 0 : i32
    %c0_i32_0 = arith.constant 0 : i32
    return %arg0, %c0_i32 : i32, i32
  }
}

</mosaic_0001>

<bundles_post_ra>
// kernel: pallas_identity_copy.1
= control target key start
LH: loop header
LB: loop body
LE: loop exit
PB: predicated region body
PF: predicated region fallthrough
CT: control target
= control target key end

     0   :  { %s38_s0 = inlined_call_operand.vmem [shape: f32[1,2048], index: 0, kind: input, shape index: {}]   ;;  %s39_s1 = inlined_call_operand.vmem [shape: f32[1,2048], index: 1, kind: output, shape index: {}]  }
   0x1   :  { %v8_v0 = vld [vmem:[%s38_s0] sm:$0xff]  ;;  %v9_v1 = vld [vmem:[%s38_s0 + $0x8] sm:$0xff] }
   0x2   :  { %10 = vst [vmem:[%s39_s1] sm:$0xff] %v8_v0  ;;  %11 = vst [vmem:[%s39_s1 + $0x8] sm:$0xff] %v9_v1 }

</bundles_post_ra>
